<compile_context>
chip_gen: v5e
topology: v5e:2x2
jax: 0.10.0
libtpu: 0.0.40
codegen_flags: <defaults>
</compile_context>

<pallas_src>
import functools
import math

import numpy as np
import jax
import jax.numpy as jnp
from jax.experimental import pallas as pl
from jax.experimental.pallas import tpu as pltpu


def _round_up(x, m):
    return (x + m - 1) // m * m


# ---------------------------------------------------------------------------
# Pallas kernels
# ---------------------------------------------------------------------------

def _matmul_affine_kernel(a_ref, b_ref, scale_ref, shift_ref, o_ref, acc_ref, *, relu):
    """acc += A @ B ; at last k-step: out = [relu](acc * scale + shift)."""
    @pl.when(pl.program_id(2) == 0)
    def _init():
        acc_ref[...] = jnp.zeros_like(acc_ref)

    acc_ref[...] += jnp.dot(a_ref[...], b_ref[...], preferred_element_type=jnp.float32)

    @pl.when(pl.program_id(2) == pl.num_programs(2) - 1)
    def _finish():
        y = acc_ref[...] * scale_ref[...] + shift_ref[...]
        if relu:
            y = jnp.maximum(y, 0.0)
        o_ref[...] = y.astype(o_ref.dtype)


def _matmul_affine_res_kernel(a_ref, b_ref, scale_ref, shift_ref, res_ref, o_ref,
                              acc_ref, *, relu):
    """Same as above but with the residual (shortcut) add fused before the ReLU."""
    @pl.when(pl.program_id(2) == 0)
    def _init():
        acc_ref[...] = jnp.zeros_like(acc_ref)

    acc_ref[...] += jnp.dot(a_ref[...], b_ref[...], preferred_element_type=jnp.float32)

    @pl.when(pl.program_id(2) == pl.num_programs(2) - 1)
    def _finish():
        y = acc_ref[...] * scale_ref[...] + shift_ref[...]
        y = y + res_ref[...].astype(jnp.float32)
        if relu:
            y = jnp.maximum(y, 0.0)
        o_ref[...] = y.astype(o_ref.dtype)


def _conv3x3_s1_kernel(x_ref, w_ref, scale_ref, shift_ref, o_ref, acc_ref, *,
                       KH, KW, dilation, rows, relu):
    """Direct stride-1 KHxKW conv for one (image, band of `rows` output rows).

    x_ref:       (Hp, Wp, Cin)    whole padded image (bf16)
    w_ref:       (KH*KW, Cin, Cout)
    scale/shift: (1, Cout) f32
    o_ref:       (rows, OW, Cout)
    acc_ref:     (rows*OW, Cout) f32 VMEM scratch
    """
    oh0 = pl.program_id(1) * rows
    ow = o_ref.shape[1]
    cin = x_ref.shape[2]

    acc_ref[...] = jnp.zeros_like(acc_ref)
    for kh in range(KH):
        xb = x_ref[pl.ds(oh0 + kh * dilation, rows)]              # (rows, Wp, Cin)
        for kw in range(KW):
            xs = xb[:, kw * dilation: kw * dilation + ow, :]      # (rows, OW, Cin)
            acc_ref[...] += jnp.dot(xs.reshape(rows * ow, cin),
                                    w_ref[kh * KW + kw],
                                    preferred_element_type=jnp.float32)
    y = acc_ref[...] * scale_ref[...] + shift_ref[...]
    if relu:
        y = jnp.maximum(y, 0.0)
    o_ref[...] = y.reshape(rows, ow, -1).astype(o_ref.dtype)


def _maxpool9_kernel(ee_ref, eo_ref, oe_ref, oo_ref, o_ref):
    """Fused 3x3 stride-2 maxpool from the four parity planes of the padded input."""
    OH, OW = o_ref.shape[0], o_ref.shape[1]
    m = jnp.maximum
    ee = ee_ref[...]          # (OH+1, OW+1, C)
    eo = eo_ref[...]          # (OH+1, OW,   C)
    oe = oe_ref[...]          # (OH,   OW+1, C)
    oo = oo_ref[...]          # (OH,   OW,   C)
    t = m(m(ee[:OH, :OW], eo[:OH]), ee[:OH, 1:OW + 1])
    t = m(t, m(m(oe[:, :OW], oo), oe[:, 1:OW + 1]))
    t = m(t, m(m(ee[1:OH + 1, :OW], eo[1:OH + 1]), ee[1:OH + 1, 1:OW + 1]))
    o_ref[...] = t


def _upsample_rows_kernel(ah_ref, x_ref, o_ref):
    # per image: (H_out, h8) @ (h8, w*C)
    o_ref[...] = jnp.dot(ah_ref[...], x_ref[...], preferred_element_type=jnp.float32)


def _upsample_cols_kernel(awt_ref, z_ref, o_ref):
    # per (image, row band): (C*rows, w8) @ (w8, W_out) -> (C, rows, W_out)  (NCHW layout)
    C, rows, w8 = z_ref.shape
    wout = o_ref.shape[2]
    y = jnp.dot(z_ref[...].reshape(C * rows, w8), awt_ref[...],
                preferred_element_type=jnp.float32)
    o_ref[...] = y.reshape(C, rows, wout)


# ---------------------------------------------------------------------------
# Matmul wrapper (tiled, bf16 MXU operands, fused affine / ReLU / residual)
# ---------------------------------------------------------------------------

def pallas_matmul_affine(a, wp, relu=False, residual=None, out_dtype=jnp.bfloat16):
    """a: (M, K).  wp: packed weights dict (unpadded bf16 B, f32 scale/shift)."""
    M, K = a.shape
    assert K == wp["K"], (K, wp["K"])
    N = wp["N"]

    a = a.astype(jnp.bfloat16)

    # K tiling: never pad A's K dim in HBM.
    if K % 128 == 0:
        tk = next(c for c in (512, 384, 256, 128) if K % c == 0)
    else:
        tk = K                                   # single k-step (block == full dim)
    # N tiling: never pad B / scale / shift / output.
    if N % 128 == 0:
        if N >= 1024 and N % 512 == 0:
            tn = 512
        elif N >= 512 and N % 256 == 0:
            tn = 256
        else:
            tn = 128
    else:
        tn = N                                   # block == full dim (e.g. 64, 21)
    # M tiling: avoid padding whenever possible.
    Mp = M
    if M % 8 == 0:
        tm = next(c for c in (512, 256, 128, 64, 32, 16, 8) if M % c == 0)
    elif M <= 1024:
        tm = M                                   # block == full dim
    else:                                        # rare fallback: pad M
        tm = 256
        Mp = _round_up(M, tm)

    has_res = residual is not None
    if Mp != M:
        a = jnp.zeros((Mp, K), jnp.bfloat16).at[:M].set(a)
        if has_res:
            residual = jnp.zeros((Mp, N), residual.dtype).at[:M].set(residual)

    b, sc, sh = wp["b"], wp["scale"], wp["shift"]
    inputs = [a, b, sc, sh]
    in_specs = [
        pl.BlockSpec((tm, tk), lambda i, j, k: (i, k)),
        pl.BlockSpec((tk, tn), lambda i, j, k: (k, j)),
        pl.BlockSpec((1, tn), lambda i, j, k: (0, j)),
        pl.BlockSpec((1, tn), lambda i, j, k: (0, j)),
    ]
    if has_res:
        inputs.append(residual)
        in_specs.append(pl.BlockSpec((tm, tn), lambda i, j, k: (i, j)))
        kernel = functools.partial(_matmul_affine_res_kernel, relu=relu)
    else:
        kernel = functools.partial(_matmul_affine_kernel, relu=relu)

    grid = (Mp // tm, N // tn, K // tk)
    out_isz = jnp.dtype(out_dtype).itemsize
    res_isz = jnp.dtype(residual.dtype).itemsize if has_res else 0
    vmem_need = (2 * (tm * tk * 2 + tk * tn * 2 + 2 * tn * 4 + tm * tn * out_isz
                      + (tm * tn * res_isz if has_res else 0))
                 + tm * tn * 4 + (2 << 20))
    cost = pl.CostEstimate(
        flops=2 * M * K * N,
        transcendentals=0,
        bytes_accessed=int(M * K * 2 + K * N * 2 + M * N * out_isz
                           + (M * N * res_isz if has_res else 0) + 2 * N * 4),
    )

    out = pl.pallas_call(
        kernel,
        out_shape=jax.ShapeDtypeStruct((Mp, N), out_dtype),
        grid_spec=pltpu.PrefetchScalarGridSpec(
            num_scalar_prefetch=0,
            grid=grid,
            in_specs=in_specs,
            out_specs=pl.BlockSpec((tm, tn), lambda i, j, k: (i, j)),
            scratch_shapes=[pltpu.VMEM((tm, tn), jnp.float32)],
        ),
        compiler_params=pltpu.CompilerParams(
            dimension_semantics=("parallel", "parallel", "arbitrary"),
            vmem_limit_bytes=int(min(128 << 20, max(vmem_need, 16 << 20)))),
        cost_estimate=cost,
    )(*inputs)
    return out if Mp == M else out[:M]


# ---------------------------------------------------------------------------
# Conv / pool / upsample wrappers
# ---------------------------------------------------------------------------

def conv1x1_affine(x, wp, relu=False, residual=None, out_dtype=jnp.bfloat16, stride=1):
    """1x1 conv + folded-BN affine (+ReLU, + optional fused residual)."""
    if stride != 1:
        x = x[:, ::stride, ::stride, :]
    N_, H_, W_, Cin = x.shape
    A = x.reshape(N_ * H_ * W_, Cin)
    y = pallas_matmul_affine(A, wp, relu=relu, residual=residual, out_dtype=out_dtype)
    return y.reshape(N_, H_, W_, wp["N"])


def conv3x3_s1_affine(x, cp, dilation=1, relu=True, out_dtype=jnp.bfloat16):
    """Stride-1 3x3 (dilated) conv; row-banded direct Pallas kernel (no im2col)."""
    N_, H_, W_, Cin = x.shape
    KH, KW, Cout = cp["KH"], cp["KW"], cp["Cout"]
    pad = dilation
    OH, OW = H_, W_
    xp = jnp.pad(x.astype(jnp.bfloat16), ((0, 0), (pad, pad), (pad, pad), (0, 0)))
    Hp, Wp = H_ + 2 * pad, W_ + 2 * pad

    rows = next(r for r in (16, 8, 4, 2, 1) if OH % r == 0)
    while rows > 1 and rows * OW * Cout * 4 > (2 << 20):   # cap the f32 accumulator
        rows //= 2
    n_bands = OH // rows

    vmem_need = (2 * Hp * Wp * Cin * 2
                 + 2 * KH * KW * Cin * Cout * 2
                 + 2 * rows * OW * Cout * jnp.dtype(out_dtype).itemsize
                 + rows * OW * Cout * 4 + (2 << 20))

    return pl.pallas_call(
        functools.partial(_conv3x3_s1_kernel, KH=KH, KW=KW, dilation=dilation,
                          rows=rows, relu=relu),
        out_shape=jax.ShapeDtypeStruct((N_, OH, OW, Cout), out_dtype),
        grid_spec=pltpu.PrefetchScalarGridSpec(
            num_scalar_prefetch=0,
            grid=(N_, n_bands),
            in_specs=[
                pl.BlockSpec((None, Hp, Wp, Cin), lambda n, b: (n, 0, 0, 0)),
                pl.BlockSpec((KH * KW, Cin, Cout), lambda n, b: (0, 0, 0)),
                pl.BlockSpec((1, Cout), lambda n, b: (0, 0)),
                pl.BlockSpec((1, Cout), lambda n, b: (0, 0)),
            ],
            out_specs=pl.BlockSpec((None, rows, OW, Cout), lambda n, b: (n, b, 0, 0)),
            scratch_shapes=[pltpu.VMEM((rows * OW, Cout), jnp.float32)],
        ),
        compiler_params=pltpu.CompilerParams(
            dimension_semantics=("parallel", "parallel"),
            vmem_limit_bytes=int(min(128 << 20, max(vmem_need, 16 << 20)))),
    )(xp, cp["w"], cp["scale"], cp["shift"])


def conv2d_im2col_affine(x, wp, kh, kw, stride, padding, dilation, relu,
                         out_dtype=jnp.bfloat16):
    """Fallback for the 3 stride-2 convs: im2col (XLA glue) + Pallas matmul."""
    # TODO(synk): the stem 7x7 and the two stride-2 3x3 convs still use XLA im2col glue.
    N_, H_, W_, Cin = x.shape
    OH = (H_ + 2 * padding - dilation * (kh - 1) - 1) // stride + 1
    OW = (W_ + 2 * padding - dilation * (kw - 1) - 1) // stride + 1
    xp = jnp.pad(x.astype(jnp.bfloat16),
                 ((0, 0), (padding, padding), (padding, padding), (0, 0)))
    patches = []
    for ih in range(kh):
        for iw in range(kw):
            hs, ws = ih * dilation, iw * dilation
            patches.append(xp[:, hs:hs + (OH - 1) * stride + 1:stride,
                                 ws:ws + (OW - 1) * stride + 1:stride, :])
    pt = jnp.stack(patches, axis=3)                      # [N, OH, OW, kh*kw, Cin]
    A = pt.reshape(N_ * OH * OW, kh * kw * Cin)
    y = pallas_matmul_affine(A, wp, relu=relu, out_dtype=out_dtype)
    return y.reshape(N_, OH, OW, wp["N"])


def maxpool_3x3_s2_p1(x):
    """3x3 / stride 2 / pad 1 maxpool: one fused Pallas kernel over 4 parity planes."""
    N_, H_, W_, C = x.shape
    OH = (H_ - 1) // 2 + 1
    OW = (W_ - 1) // 2 + 1
    neg = float("-inf")
    xp = jnp.pad(x, ((0, 0), (1, 1), (1, 1), (0, 0)), constant_values=neg)
    # parity split (single XLA rearrangement pass over the padded stem activation)
    ee = xp[:, 0::2, 0::2, :][:, :OH + 1, :OW + 1, :]
    eo = xp[:, 0::2, 1::2, :][:, :OH + 1, :OW, :]
    oe = xp[:, 1::2, 0::2, :][:, :OH, :OW + 1, :]
    oo = xp[:, 1::2, 1::2, :][:, :OH, :OW, :]

    isz = jnp.dtype(x.dtype).itemsize
    vmem_need = (2 * 4 * (OH + 1) * (OW + 1) * C * isz
                 + 2 * OH * OW * C * isz + (2 << 20))

    return pl.pallas_call(
        _maxpool9_kernel,
        out_shape=jax.ShapeDtypeStruct((N_, OH, OW, C), x.dtype),
        grid_spec=pltpu.PrefetchScalarGridSpec(
            num_scalar_prefetch=0,
            grid=(N_,),
            in_specs=[
                pl.BlockSpec((None, OH + 1, OW + 1, C), lambda n: (n, 0, 0, 0)),
                pl.BlockSpec((None, OH + 1, OW, C), lambda n: (n, 0, 0, 0)),
                pl.BlockSpec((None, OH, OW + 1, C), lambda n: (n, 0, 0, 0)),
                pl.BlockSpec((None, OH, OW, C), lambda n: (n, 0, 0, 0)),
            ],
            out_specs=pl.BlockSpec((None, OH, OW, C), lambda n: (n, 0, 0, 0)),
        ),
        compiler_params=pltpu.CompilerParams(
            dimension_semantics=("parallel",),
            vmem_limit_bytes=int(min(128 << 20, max(vmem_need, 16 << 20)))),
    )(ee, eo, oe, oo)


def _bilinear_matrix(out_size, in_size):
    """Interpolation matrix matching F.upsample_bilinear (align_corners=True)."""
    A = np.zeros((out_size, in_size), np.float32)
    if in_size == 1:
        A[:, 0] = 1.0
        return A
    if out_size == 1:
        A[0, 0] = 1.0
        return A
    scale = (in_size - 1) / (out_size - 1)
    for i in range(out_size):
        src = i * scale
        i0 = min(int(math.floor(src)), in_size - 1)
        frac = src - i0
        i1 = min(i0 + 1, in_size - 1)
        A[i, i0] += 1.0 - frac
        A[i, i1] += frac
    return A


def bilinear_upsample_nchw(x_nhwc, H_out, W_out):
    """x: [N,h,w,C] f32 -> [N,C,H_out,W_out] (NCHW), align_corners=True."""
    N_, h, w, C = x_nhwc.shape
    x = x_nhwc.astype(jnp.float32)
    h8 = _round_up(h, 8)
    w8 = _round_up(w, 8)

    Ah = np.zeros((H_out, h8), np.float32)
    Ah[:, :h] = _bilinear_matrix(H_out, h)
    AwT = np.zeros((w8, W_out), np.float32)
    AwT[:w, :] = _bilinear_matrix(W_out, w).T
    Ah = jnp.asarray(Ah)
    AwT = jnp.asarray(AwT)

    # ---- pass 1: interpolate rows   (H_out, h8) @ (h8, w*C) per image ----
    x2 = x.reshape(N_, h, w * C)
    if h8 != h:
        x2 = jnp.pad(x2, ((0, 0), (0, h8 - h), (0, 0)))
    vmem1 = 2 * (H_out * h8 * 4 + h8 * w * C * 4 + H_out * w * C * 4) + (2 << 20)
    y1 = pl.pallas_call(
        _upsample_rows_kernel,
        out_shape=jax.ShapeDtypeStruct((N_, H_out, w * C), jnp.float32),
        grid_spec=pltpu.PrefetchScalarGridSpec(
            num_scalar_prefetch=0,
            grid=(N_,),
            in_specs=[pl.BlockSpec((H_out, h8), lambda n: (0, 0)),
                      pl.BlockSpec((None, h8, w * C), lambda n: (n, 0, 0))],
            out_specs=pl.BlockSpec((None, H_out, w * C), lambda n: (n, 0, 0)),
        ),
        compiler_params=pltpu.CompilerParams(
            dimension_semantics=("parallel",),
            vmem_limit_bytes=int(min(128 << 20, max(vmem1, 16 << 20)))),
    )(Ah, x2)

    # Small intermediate relayout to (N, C, H_out, w8) — cheap vs the final output.
    z = jnp.transpose(y1.reshape(N_, H_out, w, C), (0, 3, 1, 2))      # (N, C, H_out, w)
    if w8 != w:
        z = jnp.pad(z, ((0, 0), (0, 0), (0, 0), (0, w8 - w)))

    # ---- pass 2: interpolate cols, row-banded, emits NCHW directly ----
    if H_out % 8 == 0:
        rows = next(r for r in (64, 32, 16, 8) if H_out % r == 0)
    else:
        rows = H_out
    vmem2 = 2 * (w8 * W_out * 4 + C * rows * w8 * 4 + C * rows * W_out * 4) + (2 << 20)
    out = pl.pallas_call(
        _upsample_cols_kernel,
        out_shape=jax.ShapeDtypeStruct((N_, C, H_out, W_out), jnp.float32),
        grid_spec=pltpu.PrefetchScalarGridSpec(
            num_scalar_prefetch=0,
            grid=(N_, H_out // rows),
            in_specs=[pl.BlockSpec((w8, W_out), lambda n, b: (0, 0)),
                      pl.BlockSpec((None, C, rows, w8), lambda n, b: (n, 0, b, 0))],
            out_specs=pl.BlockSpec((None, C, rows, W_out), lambda n, b: (n, 0, b, 0)),
        ),
        compiler_params=pltpu.CompilerParams(
            dimension_semantics=("parallel", "parallel"),
            vmem_limit_bytes=int(min(128 << 20, max(vmem2, 16 << 20)))),
    )(AwT, z)
    return out


# ---------------------------------------------------------------------------
# Deterministic synthetic parameters (packed for the kernels at init time)
# ---------------------------------------------------------------------------

class _KeyGen:
    def __init__(self, key):
        self._key = key

    def __call__(self):
        self._key, sub = jax.random.split(self._key)
        return sub


def _conv_weight(kg, kh, kw, cin, cout):
    std = math.sqrt(2.0 / (kh * kw * cin))
    return jax.random.normal(kg(), (kh, kw, cin, cout), jnp.float32) * std


def _bn_affine(kg, c, eps=1e-5):
    gamma = 1.0 + 0.1 * jax.random.normal(kg(), (c,), jnp.float32)
    beta = 0.1 * jax.random.normal(kg(), (c,), jnp.float32)
    mean = 0.1 * jax.random.normal(kg(), (c,), jnp.float32)
    var = 1.0 + 0.1 * jax.random.uniform(kg(), (c,), jnp.float32)
    scale = gamma / jnp.sqrt(var + eps)
    shift = beta - mean * scale
    return scale, shift


def _pack_matmul_weights(w2d, scale, shift):
    """bf16 B + f32 scale/shift, stored UNPADDED (tiling handles odd dims)."""
    K, N = w2d.shape
    return {
        "b": w2d.astype(jnp.bfloat16),
        "scale": scale.reshape(1, N).astype(jnp.float32),
        "shift": shift.reshape(1, N).astype(jnp.float32),
        "K": K, "N": N,
    }


def _pack_conv3x3_weights(w, scale, shift):
    KH, KW, Cin, Cout = w.shape
    return {
        "w": w.reshape(KH * KW, Cin, Cout).astype(jnp.bfloat16),
        "scale": scale.reshape(1, Cout).astype(jnp.float32),
        "shift": shift.reshape(1, Cout).astype(jnp.float32),
        "KH": KH, "KW": KW, "Cin": Cin, "Cout": Cout,
    }


def init_resnet50_16s_params(key, num_classes):
    kg = _KeyGen(key)
    p = {}
    w = _conv_weight(kg, 7, 7, 3, 64)
    sc, sh = _bn_affine(kg, 64)
    p["conv1"] = _pack_matmul_weights(w.reshape(49 * 3, 64), sc, sh)

    inplanes = 64
    # output_stride=16: layer4 uses stride 1 with dilation 2 (all its blocks).
    layer_cfg = [(64, 3, 1, 1), (128, 4, 2, 1), (256, 6, 2, 1), (512, 3, 1, 2)]
    layers = []
    for planes, blocks, stride, dilation in layer_cfg:
        blocks_p = []
        for bidx in range(blocks):
            s = stride if bidx == 0 else 1
            w1 = _conv_weight(kg, 1, 1, inplanes, planes)
            b1 = _bn_affine(kg, planes)
            w2 = _conv_weight(kg, 3, 3, planes, planes)
            b2 = _bn_affine(kg, planes)
            w3 = _conv_weight(kg, 1, 1, planes, planes * 4)
            b3 = _bn_affine(kg, planes * 4)
            bp = {
                "c1": _pack_matmul_weights(w1.reshape(inplanes, planes), *b1),
                "c3": _pack_matmul_weights(w3.reshape(planes, planes * 4), *b3),
                "stride": s,
                "dilation": dilation,
            }
            if s == 1:
                bp["c2"] = _pack_conv3x3_weights(w2, *b2)
            else:
                bp["c2"] = _pack_matmul_weights(w2.reshape(9 * planes, planes), *b2)
            if bidx == 0 and (s != 1 or inplanes != planes * 4):
                wd = _conv_weight(kg, 1, 1, inplanes, planes * 4)
                bd = _bn_affine(kg, planes * 4)
                bp["ds"] = _pack_matmul_weights(wd.reshape(inplanes, planes * 4), *bd)
            blocks_p.append(bp)
            inplanes = planes * 4
        layers.append(blocks_p)
    p["layers"] = layers

    # fc replaced by 1x1 conv: weight ~ N(0, 0.01), bias = 0  (_normal_initialization)
    wfc = jax.random.normal(kg(), (inplanes, num_classes), jnp.float32) * 0.01
    p["fc"] = _pack_matmul_weights(wfc,
                                   jnp.ones((num_classes,), jnp.float32),
                                   jnp.zeros((num_classes,), jnp.float32))
    return p


# ---------------------------------------------------------------------------
# Forward pass
# ---------------------------------------------------------------------------

def _bottleneck(x, bp):
    s, d = bp["stride"], bp["dilation"]
    out = conv1x1_affine(x, bp["c1"], relu=True)
    if s == 1:
        out = conv3x3_s1_affine(out, bp["c2"], dilation=d, relu=True)
    else:
        out = conv2d_im2col_affine(out, bp["c2"], 3, 3, s, d, d, relu=True)
    if "ds" in bp:
        shortcut = conv1x1_affine(x, bp["ds"], relu=False, stride=s)
    else:
        shortcut = x
    Ns, Hs, Ws, Cs = shortcut.shape
    res2d = shortcut.reshape(Ns * Hs * Ws, Cs)
    # conv3: residual add + ReLU fused into the matmul epilogue
    out = conv1x1_affine(out, bp["c3"], relu=True, residual=res2d)
    return out


def resnet50_16s_forward(params, x_nchw):
    """x_nchw: [N, 3, H, W] float32 -> logits [N, num_classes, H, W]."""
    _, _, H_in, W_in = x_nchw.shape
    x = jnp.transpose(x_nchw, (0, 2, 3, 1)).astype(jnp.bfloat16)     # NHWC, bf16

    # 7x7 stride-2 stem (im2col path; 3 input channels only)
    x = conv2d_im2col_affine(x, params["conv1"], 7, 7, 2, 3, 1, relu=True)
    x = maxpool_3x3_s2_p1(x)

    for blocks in params["layers"]:
        for bp in blocks:
            x = _bottleneck(x, bp)

    x = conv1x1_affine(x, params["fc"], relu=False, out_dtype=jnp.float32)

    # nn.functional.upsample_bilinear == interpolate(mode="bilinear", align_corners=True)
    # Pass 2 of the upsample emits NCHW directly (no trailing transpose).
    return bilinear_upsample_nchw(x, H_in, W_in)


# ---------------------------------------------------------------------------
# Main
# ---------------------------------------------------------------------------

if __name__ == "__main__":
    num_classes = 21
    key = jax.random.PRNGKey(0)
    k_params, k_input = jax.random.split(key)

    params = init_resnet50_16s_params(k_params, num_classes)
    x = jax.random.normal(k_input, (2, 3, 16, 16), jnp.float32)   # NCHW input

    out = resnet50_16s_forward(params, x)
    out = jax.block_until_ready(out)

    assert out.shape == (2, num_classes, 16, 16), out.shape
    assert bool(jnp.all(jnp.isfinite(out)))
    print("KERNEL_OK")
</pallas_src>

<mosaic_0001>
module attributes {stable_mosaic.version = 11 : i64} {
  func.func @_matmul_affine_kernel(%arg0: i32, %arg1: i32, %arg2: i32, %arg3: memref<128x147xbf16, #tpu.memory_space<vmem>>, %arg4: memref<147x64xbf16, #tpu.memory_space<vmem>>, %arg5: memref<1x64xf32, #tpu.memory_space<vmem>>, %arg6: memref<1x64xf32, #tpu.memory_space<vmem>>, %arg7: memref<128x64xbf16, #tpu.memory_space<vmem>>, %arg8: memref<128x64xf32, #tpu.memory_space<vmem>>) attributes {dimension_semantics = [#tpu.dimension_semantics<parallel>, #tpu.dimension_semantics<parallel>, #tpu.dimension_semantics<arbitrary>], iteration_bounds = array<i64: 1, 1, 1>, scalar_prefetch = 0 : i64, scratch_operands = 1 : i64, tpu.core_type = #tpu.core_type<tc>, window_params = [{transform_indices = @transform_0, window_bounds = array<i64: 128, 147>}, {transform_indices = @transform_1, window_bounds = array<i64: 147, 64>}, {transform_indices = @transform_2, window_bounds = array<i64: 1, 64>}, {transform_indices = @transform_3, window_bounds = array<i64: 1, 64>}, {transform_indices = @transform_4, window_bounds = array<i64: 128, 64>}]} {
    %c0_i32 = arith.constant 0 : i32
    %0 = arith.cmpi eq, %arg2, %c0_i32 : i32
    %1 = arith.extui %0 : i1 to i32
    %c0_i32_0 = arith.constant 0 : i32
    %2 = arith.cmpi ne, %1, %c0_i32_0 : i32
    scf.if %2 {
      %cst_10 = arith.constant 0.000000e+00 : f32
      %12 = vector.broadcast %cst_10 : f32 to vector<128x64xf32>
      %c0_11 = arith.constant 0 : index
      %c0_12 = arith.constant 0 : index
      %13 = vector.load %arg8[%c0_11, %c0_12] : memref<128x64xf32, #tpu.memory_space<vmem>>, vector<128x64xf32>
      tpu.vector_store %arg8[%c0_11, %c0_12], %12 {strides = array<i32>} : memref<128x64xf32, #tpu.memory_space<vmem>>, vector<128x64xf32>,
    } else {
    }
    %c0 = arith.constant 0 : index
    %c0_1 = arith.constant 0 : index
    %3 = vector.load %arg8[%c0, %c0_1] : memref<128x64xf32, #tpu.memory_space<vmem>>, vector<128x64xf32>
    %c0_2 = arith.constant 0 : index
    %c0_3 = arith.constant 0 : index
    %4 = vector.load %arg3[%c0_2, %c0_3] : memref<128x147xbf16, #tpu.memory_space<vmem>>, vector<128x147xbf16>
    %c0_4 = arith.constant 0 : index
    %c0_5 = arith.constant 0 : index
    %5 = vector.load %arg4[%c0_4, %c0_5] : memref<147x64xbf16, #tpu.memory_space<vmem>>, vector<147x64xbf16>
    %cst = arith.constant dense<0.000000e+00> : vector<128x64xf32>
    %6 = tpu.matmul %4, %5, %cst {dimension_numbers = #tpu.dot_dimension_numbers<[1], [0], [0], [1], [0, 0, 1, 1], [], []>} : vector<128x147xbf16>, vector<147x64xbf16>, vector<128x64xf32> -> vector<128x64xf32>
    %7 = arith.addf %3, %6 : vector<128x64xf32>
    %c0_6 = arith.constant 0 : index
    %c0_7 = arith.constant 0 : index
    %8 = vector.load %arg8[%c0_6, %c0_7] : memref<128x64xf32, #tpu.memory_space<vmem>>, vector<128x64xf32>
    tpu.vector_store %arg8[%c0_6, %c0_7], %7 {strides = array<i32>} : memref<128x64xf32, #tpu.memory_space<vmem>>, vector<128x64xf32>,
    %c0_i32_8 = arith.constant 0 : i32
    %9 = arith.cmpi eq, %arg2, %c0_i32_8 : i32
    %10 = arith.extui %9 : i1 to i32
    %c0_i32_9 = arith.constant 0 : i32
    %11 = arith.cmpi ne, %10, %c0_i32_9 : i32
    scf.if %11 {
      %c0_10 = arith.constant 0 : index
      %c0_11 = arith.constant 0 : index
      %12 = vector.load %arg8[%c0_10, %c0_11] : memref<128x64xf32, #tpu.memory_space<vmem>>, vector<128x64xf32>
      %c0_12 = arith.constant 0 : index
      %c0_13 = arith.constant 0 : index
      %13 = vector.load %arg5[%c0_12, %c0_13] : memref<1x64xf32, #tpu.memory_space<vmem>>, vector<1x64xf32>
      %14 = vector.broadcast %13 : vector<1x64xf32> to vector<128x64xf32>
      %15 = arith.mulf %12, %14 : vector<128x64xf32>
      %c0_14 = arith.constant 0 : index
      %c0_15 = arith.constant 0 : index
      %16 = vector.load %arg6[%c0_14, %c0_15] : memref<1x64xf32, #tpu.memory_space<vmem>>, vector<1x64xf32>
      %17 = vector.broadcast %16 : vector<1x64xf32> to vector<128x64xf32>
      %18 = arith.addf %15, %17 : vector<128x64xf32>
      %cst_16 = arith.constant 0.000000e+00 : f32
      %19 = vector.broadcast %cst_16 : f32 to vector<128x64xf32>
      %20 = arith.maximumf %18, %19 : vector<128x64xf32>
      %21 = arith.truncf %20 : vector<128x64xf32> to vector<128x64xbf16>
      %c0_17 = arith.constant 0 : index
      %c0_18 = arith.constant 0 : index
      %22 = vector.load %arg7[%c0_17, %c0_18] : memref<128x64xbf16, #tpu.memory_space<vmem>>, vector<128x64xbf16>
      tpu.vector_store %arg7[%c0_17, %c0_18], %21 {strides = array<i32>} : memref<128x64xbf16, #tpu.memory_space<vmem>>, vector<128x64xbf16>,
    } else {
    }
    return
  }
  func.func @transform_0(%arg0: i32, %arg1: i32, %arg2: i32) -> (i32, i32) {
    %c0_i32 = arith.constant 0 : i32
    return %arg0, %arg2 : i32, i32
  }
  func.func @transform_1(%arg0: i32, %arg1: i32, %arg2: i32) -> (i32, i32) {
    %c0_i32 = arith.constant 0 : i32
    return %arg2, %arg1 : i32, i32
  }
  func.func @transform_2(%arg0: i32, %arg1: i32, %arg2: i32) -> (i32, i32) {
    %c0_i32 = arith.constant 0 : i32
    %c0_i32_0 = arith.constant 0 : i32
    return %c0_i32, %arg1 : i32, i32
  }
  func.func @transform_3(%arg0: i32, %arg1: i32, %arg2: i32) -> (i32, i32) {
    %c0_i32 = arith.constant 0 : i32
    %c0_i32_0 = arith.constant 0 : i32
    return %c0_i32, %arg1 : i32, i32
  }
  func.func @transform_4(%arg0: i32, %arg1: i32, %arg2: i32) -> (i32, i32) {
    %c0_i32 = arith.constant 0 : i32
    return %arg0, %arg1 : i32, i32
  }
}

</mosaic_0001>

<bundles_post_ra>
// kernel: tpu_custom_call.1
= control target key start
LH: loop header
LB: loop body
LE: loop exit
PB: predicated region body
PF: predicated region fallthrough
CT: control target
= control target key end

     0   :  { %vm244_vm0 = vcmask 1040384   ;;  %vm245_vm1 = vcmask 1041408   ;;  %v641_v2 = vmov 65535   ;;  %vm219_vm2 = vcmask 154624   ;;  %s949_s1 = inlined_call_operand.vmem [shape: bf16[147,64], index: 1, kind: input, shape index: {}]   ;;  %s950_s0 = inlined_call_operand.vmem [shape: bf16[128,147], index: 0, kind: input, shape index: {}]   ;;  %s951_s2 = inlined_call_operand.vmem [shape: f32[1,64], index: 2, kind: input, shape index: {}]   ;;  %s952_s3 = inlined_call_operand.vmem [shape: f32[1,64], index: 3, kind: input, shape index: {}]   ;;  %s953_s4 = inlined_call_operand.vmem [shape: bf16[128,64], index: 4, kind: output, shape index: {}]  }
   0x1   :  { %v625_v0 = vld [vmem:[%s949_s1 + $0x38] sm:$0xff]  ;;  %v89_v1 = vld [vmem:[%s949_s1 + $0x48] sm:$0x3]  ;;  %v246_v3 = vsel %vm244_vm0, 4294967295, %v641_v2  ;;  %v624_v5 = vld [vmem:[%s949_s1 + $0x30] sm:$0xff]  ;;  %vm22_vm3 = vcmask 523264  }
   0x2   :  { %v199_v4 = vunpack.c.l.b16 %v89_v1  ;;  %251 = vmatpush.bf16.msra.mxu0 %v625_v0  ;;  %627 = vmatpush.bf16.msra.mxu2 %v625_v0  ;;  %v247_v6 = vsel %vm245_vm1, %v246_v3, 0  ;;  %v623_v9 = vld [vmem:[%s949_s1 + $0x28] sm:$0xff]  ;;  %v626_v10 = vld [vmem:[%s949_s1 + $0x40] sm:$0xff]  ;;  %v612_v13 = vld [vmem:[%s950_s0 + $0x54] sm:$0xf]  ;;  %v642_v0 = vmov 0.0  }
   0x3   :  { %v602_v11 = vld [vmem:[%s950_s0 + $0x4] sm:$0xf]  ;;  %v498_v12 = vld [vmem:[%s950_s0 + $0x8] sm:$0xf0]  ;;  %v538_v14 = vld [vmem:[%s950_s0 + $0x58] sm:$0xf0] }
   0x4   :  { %v209_v7 = vpack.c.b16 %v199_v4, %v199_v4  ;;  %v501_v15 = vor.u32 %v602_v11, %v498_v12  ;;  %v622_v16 = vld [vmem:[%s949_s1 + $0x20] sm:$0xff]  ;;  %v541_v17 = vor.u32 %v612_v13, %v538_v14  ;;  %v621_v18 = vld [vmem:[%s949_s1 + $0x18] sm:$0xff]  ;;  %v620_v19 = vld [vmem:[%s949_s1 + $0x10] sm:$0xff]  ;;  %23 = vst.msk [vmem:[#allocation2] sm:$0xff] %vm22_vm3, %v642_v0  ;;  %vm473_vm4 = vcmask 519168  }
   0x5   :  { %v619_v20 = vld [vmem:[%s949_s1 + $0x8] sm:$0xff]  ;;  %v604_v21 = vld [vmem:[%s950_s0 + $0x14] sm:$0xf]  ;;  %v506_v22 = vld [vmem:[%s950_s0 + $0x18] sm:$0xf0]  ;;  %24 = vst.msk [vmem:[#allocation2 + $0x8] sm:$0xff] %vm22_vm3, %v642_v0 }
   0x6   :  { %v249_v8 = vand.u32 %v247_v6, %v209_v7  ;;  %252 = vmatpush.bf16.msra.mxu0 %v624_v5  ;;  %628 = vmatpush.bf16.msra.mxu2 %v624_v5  ;;  %v614_v23 = vld [vmem:[%s950_s0 + $0x64] sm:$0xf]  ;;  %v546_v24 = vld [vmem:[%s950_s0 + $0x68] sm:$0xf0]  ;;  %v509_v25 = vor.u32 %v604_v21, %v506_v22  ;;  %v496_v27 = vld [vmem:[%s950_s0] sm:$0xf] }
   0x7   :  { %v618_v26 = vld [vmem:[%s949_s1] sm:$0xff]  ;;  %v603_v28 = vld [vmem:[%s950_s0 + $0x4] sm:$0xf0]  ;;  %v549_v31 = vor.u32 %v614_v23, %v546_v24  ;;  %v514_v35 = vld [vmem:[%s950_s0 + $0x28] sm:$0xf0]  ;;  %25 = vst.msk [vmem:[#allocation2 + $0x10] sm:$0xff] %vm22_vm3, %v642_v0 }
   0x8   :  { %306 = vmatpush.bf16.msra.mxu1 %v249_v8  ;;  %635 = vmatpush.bf16.msra.mxu3 %v249_v8  ;;  %v528_v29 = vld [vmem:[%s950_s0 + $0x40] sm:$0xf]  ;;  %v611_v30 = vld [vmem:[%s950_s0 + $0x44] sm:$0xf0]  ;;  %v497_v32 = vor.u32 %v603_v28, %v496_v27  ;;  %v606_v34 = vld [vmem:[%s950_s0 + $0x24] sm:$0xf] }
   0x9   :  { %v529_v33 = vor.u32 %v611_v30, %v528_v29  ;;  %v616_v36 = vld [vmem:[%s950_s0 + $0x74] sm:$0xf]  ;;  %v554_v37 = vld [vmem:[%s950_s0 + $0x78] sm:$0xf0]  ;;  %v517_v38 = vor.u32 %v606_v34, %v514_v35  ;;  %v504_v39 = vld [vmem:[%s950_s0 + $0x10] sm:$0xf] }
   0xa   :  { %253 = vmatpush.bf16.msra.mxu0 %v623_v9  ;;  %629 = vmatpush.bf16.msra.mxu2 %v623_v9  ;;  %v605_v40 = vld [vmem:[%s950_s0 + $0x14] sm:$0xf0]  ;;  %v536_v41 = vld [vmem:[%s950_s0 + $0x50] sm:$0xf]  ;;  %v557_v43 = vor.u32 %v616_v36, %v554_v37  ;;  %v608_v46 = vld [vmem:[%s950_s0 + $0x34] sm:$0xf] }
   0xb   :  { %v613_v42 = vld [vmem:[%s950_s0 + $0x54] sm:$0xf0]  ;;  %v505_v44 = vor.u32 %v605_v40, %v504_v39  ;;  %v522_v47 = vld [vmem:[%s950_s0 + $0x38] sm:$0xf0]  ;;  %v512_v49 = vld [vmem:[%s950_s0 + $0x20] sm:$0xf] }
   0xc   :  { %307 = vmatpush.bf16.msra.mxu1 %v626_v10  ;;  %636 = vmatpush.bf16.msra.mxu3 %v626_v10  ;;  %v537_v45 = vor.u32 %v613_v42, %v536_v41  ;;  %v525_v48 = vor.u32 %v608_v46, %v522_v47  ;;  %v607_v50 = vld [vmem:[%s950_s0 + $0x24] sm:$0xf0]  ;;  %v544_v51 = vld [vmem:[%s950_s0 + $0x60] sm:$0xf]  ;;  %v610_v55 = vld [vmem:[%s950_s0 + $0x44] sm:$0xf] }
   0xd   :  { %v615_v52 = vld [vmem:[%s950_s0 + $0x64] sm:$0xf0]  ;;  %v513_v53 = vor.u32 %v607_v50, %v512_v49  ;;  %v530_v56 = vld [vmem:[%s950_s0 + $0x48] sm:$0xf0]  ;;  %v520_v58 = vld [vmem:[%s950_s0 + $0x30] sm:$0xf] }
   0xe   :  { %254 = vmatpush.bf16.msra.mxu0 %v622_v16  ;;  %630 = vmatpush.bf16.msra.mxu2 %v622_v16  ;;  %v545_v54 = vor.u32 %v615_v52, %v544_v51  ;;  %v533_v57 = vor.u32 %v610_v55, %v530_v56  ;;  %v609_v59 = vld [vmem:[%s950_s0 + $0x34] sm:$0xf0]  ;;  %v552_v60 = vld [vmem:[%s950_s0 + $0x70] sm:$0xf]  ;;  %26 = vst.msk [vmem:[#allocation2 + $0x18] sm:$0xff] %vm22_vm3, %v642_v0  ;;  %v39_v4 = vld [vmem:[#allocation2] sm:$0xff] }
   0xf   :  { %594 = vmatmul.msk.bf16.vlgmr.msra.gmra.mxu1 %vm219_vm2, %v501_v15  ;;  %599 = vmatmul.msk.bf16.vlgmr.msra.gmra.mxu3 %vm219_vm2, %v541_v17  ;;  %v617_v61 = vld [vmem:[%s950_s0 + $0x74] sm:$0xf0]  ;;  %v521_v62 = vor.u32 %v609_v59, %v520_v58  ;;  %27 = vst.msk [vmem:[#allocation2 + $0x20] sm:$0xff] %vm22_vm3, %v642_v0  ;;  %v40_v10 = vld [vmem:[#allocation2 + $0x8] sm:$0xff]  ;;  %v824_v12 = vld [vmem:[%s951_s2] ss:$0 sm:$0xff] }
  0x10   :  { %v553_v63 = vor.u32 %v617_v61, %v552_v60  ;;  %28 = vst.msk [vmem:[#allocation2 + $0x28] sm:$0xff] %vm22_vm3, %v642_v0  ;;  %v829_v14 = vld [vmem:[%s952_s3] ss:$0 sm:$0xff]  ;;  %v41_v22 = vld [vmem:[#allocation2 + $0x10] sm:$0xff] }
  0x11   :  { %29 = vst.msk [vmem:[#allocation2 + $0x30] sm:$0xff] %vm22_vm3, %v642_v0 }
  0x12   :  { %255 = vmatpush.bf16.msra.mxu0 %v621_v18  ;;  %631 = vmatpush.bf16.msra.mxu2 %v621_v18  ;;  %30 = vst.msk [vmem:[#allocation2 + $0x38] sm:$0xff] %vm22_vm3, %v642_v0 }
  0x13   :  { %31 = vst.msk [vmem:[#allocation2 + $0x40] sm:$0xff] %vm22_vm3, %v642_v0 }
  0x14   :  { %32 = vst.msk [vmem:[#allocation2 + $0x48] sm:$0xff] %vm22_vm3, %v642_v0 }
  0x15   :  { %33 = vst.msk [vmem:[#allocation2 + $0x50] sm:$0xff] %vm22_vm3, %v642_v0  ;;  %v42_v36 = vld [vmem:[#allocation2 + $0x18] sm:$0xff] }
  0x16   :  { %256 = vmatpush.bf16.msra.mxu0 %v620_v19  ;;  %632 = vmatpush.bf16.msra.mxu2 %v620_v19  ;;  %34 = vst.msk [vmem:[#allocation2 + $0x58] sm:$0xff] %vm22_vm3, %v642_v0  ;;  %v43_v50 = vld [vmem:[#allocation2 + $0x20] sm:$0xff] }
  0x17   :  { %35 = vst.msk [vmem:[#allocation2 + $0x60] sm:$0xff] %vm22_vm3, %v642_v0 }
  0x18   :  { %36 = vst.msk [vmem:[#allocation2 + $0x68] sm:$0xff] %vm22_vm3, %v642_v0 }
  0x19   :  { %37 = vst.msk [vmem:[#allocation2 + $0x70] sm:$0xff] %vm22_vm3, %v642_v0 }
  0x1a   :  { %257 = vmatpush.bf16.msra.mxu0 %v619_v20  ;;  %633 = vmatpush.bf16.msra.mxu2 %v619_v20  ;;  %38 = vst.msk [vmem:[#allocation2 + $0x78] sm:$0xff] %vm22_vm3, %v642_v0 }
  0x1d   :  { %v50_v46 = vld [vmem:[#allocation2 + $0x58] sm:$0xff] }
  0x1e   :  { %258 = vmatpush.bf16.msra.mxu0 %v618_v26  ;;  %634 = vmatpush.bf16.msra.mxu2 %v618_v26  ;;  %v51_v0 = vld [vmem:[#allocation2 + $0x60] sm:$0xff] }
  0x1f   :  { %595 = vmatmul.msk.bf16.gmra.mxu1 %vm219_vm2, %v509_v25  ;;  %600 = vmatmul.msk.bf16.gmra.mxu3 %vm219_vm2, %v549_v31 }
  0x21   :  { %259 = vmatmul.bf16.vlgmr.msra.gmra.mxu0 %v497_v32  ;;  %279 = vmatmul.bf16.vlgmr.msra.gmra.mxu2 %v529_v33  ;;  %v49_v32 = vld [vmem:[#allocation2 + $0x50] sm:$0xff] }
  0x2f   :  { %596 = vmatmul.msk.bf16.gmra.mxu1 %vm219_vm2, %v517_v38  ;;  %601 = vmatmul.msk.bf16.gmra.mxu3 %vm219_vm2, %v557_v43 }
  0x31   :  { %264 = vmatmul.bf16.gmra.mxu0 %v505_v44  ;;  %284 = vmatmul.bf16.gmra.mxu2 %v537_v45 }
  0x3f   :  { %597 = vmatmul.msk.bf16.gmra.mxu1 %vm219_vm2, %v525_v48 }
  0x41   :  { %269 = vmatmul.bf16.gmra.mxu0 %v513_v53  ;;  %289 = vmatmul.bf16.gmra.mxu2 %v545_v54 }
  0x4f   :  { %598 = vmatmul.msk.bf16.gmra.mxu1 %vm219_vm2, %v533_v57 }
  0x51   :  { %274 = vmatmul.bf16.gmra.mxu0 %v521_v62  ;;  %294 = vmatmul.bf16.gmra.mxu2 %v553_v63 }
  0x8c   :  { %v309_v1 = vpop.f32.mrf.mxu1 }
  0x92   :  { %v334_v19 = vpop.f32.mrf.mxu3 }
  0x94   :  { %v311_v2 = vpop.f32.mrf.mxu1 }
  0x9a   :  { %v336_v34 = vpop.f32.mrf.mxu3 }
  0x9c   :  { %v314_v3 = vpop.f32.mrf.mxu1 }
  0x9e   :  { %v260_v5 = vpop.f32.mrf.mxu0 }
  0x9f   :  { %v310_v6 = vadd.f32 %v309_v1, %v260_v5  ;;  %v44_v5 = vld [vmem:[#allocation2 + $0x28] sm:$0xff] }
  0xa1   :  { %v349_v7 = vadd.f32 %v310_v6, %v39_v4 }
  0xa2   :  { %v339_v52 = vpop.f32.mrf.mxu3 }
  0xa3   :  { %366 = vst.msk [vmem:[#allocation2] sm:$0xff] %vm22_vm3, %v349_v7 }
  0xa4   :  { %v316_v8 = vpop.f32.mrf.mxu1  ;;  %v819_v9 = vpop.f32.mrf.mxu2 }
  0xa6   :  { %v262_v11 = vpop.f32.mrf.mxu0 }
  0xa7   :  { %v312_v13 = vadd.f32 %v311_v2, %v262_v11 }
  0xa9   :  { %v350_v15 = vadd.f32 %v312_v13, %v40_v10 }
  0xaa   :  { %v385_v16 = vld [vmem:[#allocation2] sm:$0xff] }
  0xab   :  { %v405_v17 = vmul.f32 %v824_v12, %v385_v16  ;;  %367 = vst.msk [vmem:[#allocation2 + $0x8] sm:$0xff] %vm22_vm3, %v350_v15  ;;  %v341_v15 = vpop.f32.mrf.mxu3 }
  0xac   :  { %v319_v18 = vpop.f32.mrf.mxu1  ;;  %v834_v21 = vpop.f32.mrf.mxu2 }
  0xad   :  { %v425_v20 = vadd.f32 %v829_v14, %v405_v17 }
  0xae   :  { %v265_v23 = vpop.f32.mrf.mxu0 }
  0xaf   :  { %v441_v24 = vmax.f32 %v425_v20, 0.0  ;;  %v315_v25 = vadd.f32 %v314_v3, %v265_v23 }
  0xb1   :  { %v457_v26 = vpack.c.bf16 %v441_v24, %v441_v24  ;;  %v351_v27 = vadd.f32 %v315_v25, %v41_v22  ;;  %v47_v22 = vld [vmem:[#allocation2 + $0x40] sm:$0xff] }
  0xb2   :  { %v386_v28 = vld [vmem:[#allocation2 + $0x8] sm:$0xff] }
  0xb3   :  { %474 = vst.msk [vmem:[%s953_s4] sm:$0xf] %vm473_vm4, %v457_v26  ;;  %v406_v29 = vmul.f32 %v824_v12, %v386_v28 }
  0xb4   :  { %v321_v30 = vpop.f32.mrf.mxu1  ;;  %368 = vst.msk [vmem:[#allocation2 + $0x10] sm:$0xff] %vm22_vm3, %v351_v27  ;;  %v285_v33 = vpop.f32.mrf.mxu2  ;;  %v52_v27 = vld [vmem:[#allocation2 + $0x68] sm:$0xff] }
  0xb5   :  { %v426_v31 = vadd.f32 %v829_v14, %v406_v29  ;;  %v335_v35 = vadd.f32 %v334_v19, %v285_v33 }
  0xb6   :  { %v267_v37 = vpop.f32.mrf.mxu0 }
  0xb7   :  { %v442_v38 = vmax.f32 %v426_v31, 0.0  ;;  %v317_v39 = vadd.f32 %v316_v8, %v267_v37  ;;  %v359_v40 = vadd.f32 %v335_v35, %v49_v32  ;;  %v45_v32 = vld [vmem:[#allocation2 + $0x30] sm:$0xff] }
  0xb9   :  { %v458_v41 = vpack.c.bf16 %v442_v38, %v442_v38  ;;  %v352_v42 = vadd.f32 %v317_v39, %v42_v36  ;;  %376 = vst.msk [vmem:[#allocation2 + $0x50] sm:$0xff] %vm22_vm3, %v359_v40 }
  0xbb   :  { %475 = vst.msk [vmem:[%s953_s4 + $0x4] sm:$0xf] %vm473_vm4, %v458_v41  ;;  %v387_v43 = vld [vmem:[#allocation2 + $0x10] sm:$0xff]  ;;  %v344_v41 = vpop.f32.mrf.mxu3 }
  0xbc   :  { %v324_v44 = vpop.f32.mrf.mxu1  ;;  %v407_v45 = vmul.f32 %v824_v12, %v387_v43  ;;  %369 = vst.msk [vmem:[#allocation2 + $0x18] sm:$0xff] %vm22_vm3, %v352_v42  ;;  %v287_v47 = vpop.f32.mrf.mxu2  ;;  %v48_v42 = vld [vmem:[#allocation2 + $0x48] sm:$0xff] }
  0xbd   :  { %v337_v49 = vadd.f32 %v336_v34, %v287_v47 }
  0xbe   :  { %v427_v48 = vadd.f32 %v829_v14, %v407_v45  ;;  %v270_v51 = vpop.f32.mrf.mxu0 }
  0xbf   :  { %v320_v53 = vadd.f32 %v319_v18, %v270_v51  ;;  %v360_v55 = vadd.f32 %v337_v49, %v50_v46 }
  0xc0   :  { %v443_v54 = vmax.f32 %v427_v48, 0.0  ;;  %v395_v56 = vld [vmem:[#allocation2 + $0x50] sm:$0xff] }
  0xc1   :  { %v353_v57 = vadd.f32 %v320_v53, %v43_v50  ;;  %v415_v59 = vmul.f32 %v824_v12, %v395_v56  ;;  %377 = vst.msk [vmem:[#allocation2 + $0x58] sm:$0xff] %vm22_vm3, %v360_v55  ;;  %v53_v48 = vld [vmem:[#allocation2 + $0x70] sm:$0xff] }
  0xc2   :  { %v459_v58 = vpack.c.bf16 %v443_v54, %v443_v54 }
  0xc3   :  { %v388_v60 = vld [vmem:[#allocation2 + $0x18] sm:$0xff]  ;;  %370 = vst.msk [vmem:[#allocation2 + $0x20] sm:$0xff] %vm22_vm3, %v353_v57  ;;  %v435_v62 = vadd.f32 %v829_v14, %v415_v59 }
  0xc4   :  { %v854_v61 = vpop.f32.mrf.mxu1  ;;  %476 = vst.msk [vmem:[%s953_s4 + $0x8] sm:$0xf] %vm473_vm4, %v459_v58  ;;  %v408_v63 = vmul.f32 %v824_v12, %v388_v60  ;;  %v290_v1 = vpop.f32.mrf.mxu2 }
  0xc5   :  { %v451_v2 = vmax.f32 %v435_v62, 0.0  ;;  %v340_v4 = vadd.f32 %v339_v52, %v290_v1  ;;  %v46_v52 = vld [vmem:[#allocation2 + $0x38] sm:$0xff] }
  0xc6   :  { %v428_v3 = vadd.f32 %v829_v14, %v408_v63  ;;  %v272_v6 = vpop.f32.mrf.mxu0 }
  0xc7   :  { %v322_v7 = vadd.f32 %v321_v30, %v272_v6  ;;  %v467_v8 = vpack.c.bf16 %v451_v2, %v451_v2  ;;  %v361_v11 = vadd.f32 %v340_v4, %v51_v0  ;;  %v54_v6 = vld [vmem:[#allocation2 + $0x78] sm:$0xff] }
  0xc8   :  { %v444_v10 = vmax.f32 %v428_v3, 0.0  ;;  %v396_v13 = vld [vmem:[#allocation2 + $0x58] sm:$0xff] }
  0xc9   :  { %v354_v16 = vadd.f32 %v322_v7, %v44_v5  ;;  %484 = vst.msk [vmem:[%s953_s4 + $0x28] sm:$0xf] %vm473_vm4, %v467_v8  ;;  %v416_v18 = vmul.f32 %v824_v12, %v396_v13  ;;  %v346_v5 = vpop.f32.mrf.mxu3 }
  0xca   :  { %v460_v17 = vpack.c.bf16 %v444_v10, %v444_v10  ;;  %v389_v19 = vld [vmem:[#allocation2 + $0x20] sm:$0xff]  ;;  %378 = vst.msk [vmem:[#allocation2 + $0x60] sm:$0xff] %vm22_vm3, %v361_v11 }
  0xcb   :  { %v409_v20 = vmul.f32 %v824_v12, %v389_v19  ;;  %v436_v24 = vadd.f32 %v829_v14, %v416_v18  ;;  %371 = vst.msk [vmem:[#allocation2 + $0x28] sm:$0xff] %vm22_vm3, %v354_v16 }
  0xcc   :  { %v329_v23 = vpop.f32.mrf.mxu1  ;;  %477 = vst.msk [vmem:[%s953_s4 + $0xc] sm:$0xf] %vm473_vm4, %v460_v17  ;;  %v292_v28 = vpop.f32.mrf.mxu2 }
  0xcd   :  { %v330_v25 = vadd.f32 %v329_v23, %v819_v9  ;;  %v429_v26 = vadd.f32 %v829_v14, %v409_v20  ;;  %v452_v29 = vmax.f32 %v436_v24, 0.0  ;;  %v342_v31 = vadd.f32 %v341_v15, %v292_v28 }
  0xce   :  { %v275_v33 = vpop.f32.mrf.mxu0 }
  0xcf   :  { %v357_v30 = vadd.f32 %v330_v25, %v47_v22  ;;  %v445_v34 = vmax.f32 %v429_v26, 0.0  ;;  %v325_v35 = vadd.f32 %v324_v44, %v275_v33  ;;  %v468_v36 = vpack.c.bf16 %v452_v29, %v452_v29 }
  0xd0   :  { %v362_v37 = vadd.f32 %v342_v31, %v52_v27 }
  0xd1   :  { %374 = vst.msk [vmem:[#allocation2 + $0x40] sm:$0xff] %vm22_vm3, %v357_v30  ;;  %v461_v38 = vpack.c.bf16 %v445_v34, %v445_v34  ;;  %v355_v39 = vadd.f32 %v325_v35, %v45_v32  ;;  %v397_v9 = vld [vmem:[#allocation2 + $0x60] sm:$0xff] }
  0xd2   :  { %485 = vst.msk [vmem:[%s953_s4 + $0x2c] sm:$0xf] %vm473_vm4, %v468_v36  ;;  %v417_v40 = vmul.f32 %v824_v12, %v397_v9  ;;  %v390_v44 = vld [vmem:[#allocation2 + $0x28] sm:$0xff] }
  0xd3   :  { %478 = vst.msk [vmem:[%s953_s4 + $0x10] sm:$0xf] %vm473_vm4, %v461_v38  ;;  %v410_v47 = vmul.f32 %v824_v12, %v390_v44 }
  0xd4   :  { %v331_v43 = vpop.f32.mrf.mxu1  ;;  %379 = vst.msk [vmem:[#allocation2 + $0x68] sm:$0xff] %vm22_vm3, %v362_v37  ;;  %v437_v46 = vadd.f32 %v829_v14, %v417_v40  ;;  %v295_v49 = vpop.f32.mrf.mxu2 }
  0xd5   :  { %v332_v45 = vadd.f32 %v331_v43, %v834_v21  ;;  %372 = vst.msk [vmem:[#allocation2 + $0x30] sm:$0xff] %vm22_vm3, %v355_v39  ;;  %v345_v51 = vadd.f32 %v344_v41, %v295_v49  ;;  %v430_v55 = vadd.f32 %v829_v14, %v410_v47 }
  0xd6   :  { %v277_v53 = vpop.f32.mrf.mxu0  ;;  %v453_v54 = vmax.f32 %v437_v46, 0.0 }
  0xd7   :  { %v358_v50 = vadd.f32 %v332_v45, %v48_v42  ;;  %v327_v57 = vadd.f32 %v854_v61, %v277_v53  ;;  %v363_v58 = vadd.f32 %v345_v51, %v53_v48  ;;  %v446_v60 = vmax.f32 %v430_v55, 0.0 }
  0xd8   :  { %v393_v56 = vld [vmem:[#allocation2 + $0x40] sm:$0xff]  ;;  %v469_v59 = vpack.c.bf16 %v453_v54, %v453_v54 }
  0xd9   :  { %v413_v21 = vmul.f32 %v824_v12, %v393_v56  ;;  %375 = vst.msk [vmem:[#allocation2 + $0x48] sm:$0xff] %vm22_vm3, %v358_v50  ;;  %v356_v62 = vadd.f32 %v327_v57, %v46_v52  ;;  %v462_v0 = vpack.c.bf16 %v446_v60, %v446_v60 }
  0xda   :  { %380 = vst.msk [vmem:[#allocation2 + $0x70] sm:$0xff] %vm22_vm3, %v363_v58 }
  0xdb   :  { %v433_v63 = vadd.f32 %v829_v14, %v413_v21  ;;  %486 = vst.msk [vmem:[%s953_s4 + $0x30] sm:$0xf] %vm473_vm4, %v469_v59  ;;  %v398_v1 = vld [vmem:[#allocation2 + $0x68] sm:$0xff] }
  0xdc   :  { %v418_v2 = vmul.f32 %v824_v12, %v398_v1  ;;  %v391_v3 = vld [vmem:[#allocation2 + $0x30] sm:$0xff]  ;;  %373 = vst.msk [vmem:[#allocation2 + $0x38] sm:$0xff] %vm22_vm3, %v356_v62  ;;  %v297_v7 = vpop.f32.mrf.mxu2 }
  0xdd   :  { %v449_v61 = vmax.f32 %v433_v63, 0.0  ;;  %479 = vst.msk [vmem:[%s953_s4 + $0x14] sm:$0xf] %vm473_vm4, %v462_v0  ;;  %v411_v4 = vmul.f32 %v824_v12, %v391_v3  ;;  %v347_v11 = vadd.f32 %v346_v5, %v297_v7 }
  0xde   :  { %v438_v10 = vadd.f32 %v829_v14, %v418_v2 }
  0xdf   :  { %v465_v8 = vpack.c.bf16 %v449_v61, %v449_v61  ;;  %v431_v13 = vadd.f32 %v829_v14, %v411_v4  ;;  %v364_v18 = vadd.f32 %v347_v11, %v54_v6 }
  0xe0   :  { %v394_v15 = vld [vmem:[#allocation2 + $0x48] sm:$0xff]  ;;  %v454_v16 = vmax.f32 %v438_v10, 0.0 }
  0xe1   :  { %482 = vst.msk [vmem:[%s953_s4 + $0x20] sm:$0xf] %vm473_vm4, %v465_v8  ;;  %v414_v17 = vmul.f32 %v824_v12, %v394_v15  ;;  %v447_v19 = vmax.f32 %v431_v13, 0.0  ;;  %v399_v20 = vld [vmem:[#allocation2 + $0x70] sm:$0xff] }
  0xe2   :  { %v470_v22 = vpack.c.bf16 %v454_v16, %v454_v16  ;;  %v419_v24 = vmul.f32 %v824_v12, %v399_v20  ;;  %381 = vst.msk [vmem:[#allocation2 + $0x78] sm:$0xff] %vm22_vm3, %v364_v18 }
  0xe3   :  { %v434_v23 = vadd.f32 %v829_v14, %v414_v17  ;;  %v463_v25 = vpack.c.bf16 %v447_v19, %v447_v19  ;;  %v392_v26 = vld [vmem:[#allocation2 + $0x38] sm:$0xff] }
  0xe4   :  { %487 = vst.msk [vmem:[%s953_s4 + $0x34] sm:$0xf] %vm473_vm4, %v470_v22  ;;  %v439_v28 = vadd.f32 %v829_v14, %v419_v24  ;;  %v412_v29 = vmul.f32 %v824_v12, %v392_v26 }
  0xe5   :  { %v450_v27 = vmax.f32 %v434_v23, 0.0  ;;  %480 = vst.msk [vmem:[%s953_s4 + $0x18] sm:$0xf] %vm473_vm4, %v463_v25 }
  0xe6   :  { %v455_v31 = vmax.f32 %v439_v28, 0.0  ;;  %v432_v32 = vadd.f32 %v829_v14, %v412_v29 }
  0xe7   :  { %v466_v30 = vpack.c.bf16 %v450_v27, %v450_v27 }
  0xe8   :  { %v471_v33 = vpack.c.bf16 %v455_v31, %v455_v31  ;;  %v448_v34 = vmax.f32 %v432_v32, 0.0 }
  0xe9   :  { %483 = vst.msk [vmem:[%s953_s4 + $0x24] sm:$0xf] %vm473_vm4, %v466_v30  ;;  %v400_v35 = vld [vmem:[#allocation2 + $0x78] sm:$0xff] }
  0xea   :  { %488 = vst.msk [vmem:[%s953_s4 + $0x38] sm:$0xf] %vm473_vm4, %v471_v33  ;;  %v464_v36 = vpack.c.bf16 %v448_v34, %v448_v34  ;;  %v420_v37 = vmul.f32 %v824_v12, %v400_v35 }
  0xec   :  { %481 = vst.msk [vmem:[%s953_s4 + $0x1c] sm:$0xf] %vm473_vm4, %v464_v36  ;;  %v440_v38 = vadd.f32 %v829_v14, %v420_v37 }
  0xee   :  { %v456_v39 = vmax.f32 %v440_v38, 0.0 }
  0xf0   :  { %v472_v9 = vpack.c.bf16 %v456_v39, %v456_v39 }
  0xf2   :  { %489 = vst.msk [vmem:[%s953_s4 + $0x3c] sm:$0xf] %vm473_vm4, %v472_v9 }

</bundles_post_ra>
